<compile_context>
chip_gen: v6e
topology: v6e:2x2x1
jax: 0.10.0
libtpu: 0.0.40
codegen_flags: <defaults>
</compile_context>

<pallas_src>
import jax
import jax.numpy as jnp
from jax import lax
from jax.experimental import pallas as pl
from jax.experimental.pallas import tpu as pltpu

INPUT_DIM = 16
HIDDEN_DIM = 32
BATCH = 8

TOL = 5e-5
C = 1.0 + 1e-6
MAX_ITERS = 128
INNER_UNROLL = 8                        # convergence checked once per 8 steps
MAX_CHUNKS = MAX_ITERS // INNER_UNROLL  # 16 chunks * 8 = 128 max iterations

PACK = 4           # samples packed per row (4-way everywhere; 8 fills v6e/v7x MXU)
BLOCK_ROWS = 512   # packed rows per grid block (= 2048 samples per block)


def _softplus(x):
    # torch.nn.Softplus(beta=1, threshold=20)
    safe = jnp.where(x > 20.0, 0.0, x)
    return jnp.where(x > 20.0, x, jnp.log1p(jnp.exp(safe)))


def _block_diag(m, k):
    r, c = m.shape
    out = jnp.zeros((k * r, k * c), m.dtype)
    for i in range(k):
        out = out.at[i * r:(i + 1) * r, i * c:(i + 1) * c].set(m)
    return out


def phi_w_fixed_kernel(x_ref, wnl_ref, b_ref, wlin_ref, out_ref):
    # All operands are lane-dense packed blocks (last dim 64 / 128).
    x = x_ref[...]          # (R, PACK*D)
    wnl = wnl_ref[...]      # (PACK*D, PACK*H)  block-diag W_nl^T
    b = b_ref[...]          # (1, PACK*H)       tiled bias
    wlin = wlin_ref[...]    # (PACK*H, PACK*H)  block-diag W_lin^T, pre-scaled 1/w_norm

    # h_ = Softplus(Linear(x)) -- hoisted, reused by every iteration.
    h = _softplus(jnp.dot(x, wnl, preferred_element_type=jnp.float32) + b)

    tol2 = jnp.float32(TOL * TOL)

    # Early-exit fixed-point loop.  Each while-body runs INNER_UNROLL dependent
    # MXU matmuls (statically unrolled -> visible to the LLO scheduler).  The
    # convergence delta is taken on the FIRST step of the chunk so the XLU
    # reduce + scalar readback + branch overlap the remaining matmuls.  At most
    # INNER_UNROLL-1 extra contractive steps are applied past PyTorch's break
    # point; the map is a contraction so the result only gets closer to the
    # fixed point (stays well inside the 1e-4 tolerance).
    # NOTE: when the batch is split over the grid, the norm is per batch-block
    # rather than global (difference bounded by ~tol; exact for grid size 1).
    def cond(carry):
        i, _, err2 = carry
        return jnp.logical_and(i < MAX_CHUNKS, err2 >= tol2)

    def body(carry):
        i, z, _ = carry
        zn = jnp.dot(z, wlin, preferred_element_type=jnp.float32) + h
        d = zn - z
        err2 = jnp.sum(d * d)           # early: overlaps the next 7 matmuls
        z = zn
        for _ in range(INNER_UNROLL - 1):
            z = jnp.dot(z, wlin, preferred_element_type=jnp.float32) + h
        return i + 1, z, err2

    # z0 = h: identical to PyTorch's first iteration from z = 0 (which yields
    # zn = h, err = ||h|| >= tol for any non-trivial h), one matmul cheaper.
    _, z, _ = lax.while_loop(
        cond, body, (jnp.int32(0), h, jnp.float32(jnp.inf)))

    # Tail: w_z = linear(z)/w_norm ; z2 = w_z + h ;
    #       z_out = linear(linear(z2)/w_norm + h)/w_norm ; out = z_out + h
    w_z = jnp.dot(z, wlin, preferred_element_type=jnp.float32)
    z2 = w_z + h
    t = jnp.dot(z2, wlin, preferred_element_type=jnp.float32) + h
    z_out = jnp.dot(t, wlin, preferred_element_type=jnp.float32)

    out_ref[...] = z_out + h


@jax.jit
def phi_w_fixed(x, w_nl, b_nl, w_lin):
    n, d = x.shape
    h_dim = w_nl.shape[0]

    # ---- one-time weight prep in the wrapper (hoisted off the kernel path) ----
    w_lin = w_lin.astype(jnp.float32)
    w_norm = C * (jnp.sqrt(jnp.sum(w_lin * w_lin)) + 1e-6)
    wlin_s = w_lin.T * (1.0 / w_norm)                       # (H, H), pre-scaled
    wnl_t = w_nl.T.astype(jnp.float32)                      # (D, H)

    wnl_bd = _block_diag(wnl_t, PACK)                       # (PACK*D, PACK*H)
    wlin_bd = _block_diag(wlin_s, PACK)                     # (PACK*H, PACK*H)
    b_bd = jnp.tile(b_nl.astype(jnp.float32).reshape(1, h_dim), (1, PACK))

    # ---- pack PACK samples per row; pad so the grid always tiles cleanly ----
    rows = -(-n // PACK)                                    # ceil(n / PACK)
    if rows > BLOCK_ROWS:
        blk = BLOCK_ROWS
        r_pad = -(-rows // BLOCK_ROWS) * BLOCK_ROWS
    else:
        blk = rows
        r_pad = rows
    grid_r = r_pad // blk
    n_pad = r_pad * PACK

    x_p = x.astype(jnp.float32)
    if n_pad != n:
        # Padded rows are zero: h = softplus(b), converges immediately, only
        # nudges the per-block convergence norm (bounded by ~tol).
        x_p = jnp.pad(x_p, ((0, n_pad - n), (0, 0)))
    x_packed = x_p.reshape(r_pad, PACK * d)

    out_packed = pl.pallas_call(
        phi_w_fixed_kernel,
        out_shape=jax.ShapeDtypeStruct((r_pad, PACK * h_dim), jnp.float32),
        grid=(grid_r,),
        in_specs=[
            pl.BlockSpec((blk, PACK * d), lambda i: (i, 0)),
            pl.BlockSpec((PACK * d, PACK * h_dim), lambda i: (0, 0)),
            pl.BlockSpec((1, PACK * h_dim), lambda i: (0, 0)),
            pl.BlockSpec((PACK * h_dim, PACK * h_dim), lambda i: (0, 0)),
        ],
        out_specs=pl.BlockSpec((blk, PACK * h_dim), lambda i: (i, 0)),
        compiler_params=pltpu.CompilerParams(
            dimension_semantics=("parallel",)),
    )(x_packed, wnl_bd, b_bd, wlin_bd)

    return out_packed.reshape(n_pad, h_dim)[:n]


def phi_w_fixed_ref(x, w_nl, b_nl, w_lin):
    """Pure-JAX (eager) reference mirroring the PyTorch forward."""
    w_norm = C * (jnp.sqrt(jnp.sum(w_lin * w_lin)) + 1e-6)
    h = _softplus(x @ w_nl.T + b_nl[None, :])
    z = jnp.zeros_like(h)
    for _ in range(MAX_ITERS):
        zn = (z @ w_lin.T) / w_norm + h
        err = float(jnp.sqrt(jnp.sum((zn - z) ** 2)))
        z = zn
        if err < TOL:
            break
    w_z = (z @ w_lin.T) / w_norm
    z2 = w_z + h
    z_out = (((z2 @ w_lin.T) / w_norm + h) @ w_lin.T) / w_norm
    return z_out + h


if __name__ == "__main__":
    key = jax.random.PRNGKey(0)
    kx, k1, k2, k3 = jax.random.split(key, 4)

    x = jax.random.normal(kx, (BATCH, INPUT_DIM), dtype=jnp.float32)

    # Deterministic, PyTorch-style uniform(-1/sqrt(fan_in), 1/sqrt(fan_in)) init.
    bound_nl = 1.0 / jnp.sqrt(float(INPUT_DIM))
    w_nl = jax.random.uniform(k1, (HIDDEN_DIM, INPUT_DIM), jnp.float32,
                              -bound_nl, bound_nl)
    b_nl = jax.random.uniform(k2, (HIDDEN_DIM,), jnp.float32,
                              -bound_nl, bound_nl)
    bound_lin = 1.0 / jnp.sqrt(float(HIDDEN_DIM))
    w_lin = jax.random.uniform(k3, (HIDDEN_DIM, HIDDEN_DIM), jnp.float32,
                               -bound_lin, bound_lin)

    out = phi_w_fixed(x, w_nl, b_nl, w_lin)
    out = jax.block_until_ready(out)

    ref = phi_w_fixed_ref(x, w_nl, b_nl, w_lin)
    assert out.shape == (BATCH, HIDDEN_DIM)
    assert jnp.allclose(out, ref, atol=1e-4, rtol=1e-4), "mismatch vs reference"

    print("KERNEL_OK")
</pallas_src>

<mosaic_0001>
module attributes {stable_mosaic.version = 11 : i64} {
  func.func @phi_w_fixed_kernel(%arg0: i32, %arg1: memref<2x64xf32, #tpu.memory_space<vmem>>, %arg2: memref<64x128xf32, #tpu.memory_space<vmem>>, %arg3: memref<1x128xf32, #tpu.memory_space<vmem>>, %arg4: memref<128x128xf32, #tpu.memory_space<vmem>>, %arg5: memref<2x128xf32, #tpu.memory_space<vmem>>) attributes {dimension_semantics = [#tpu.dimension_semantics<parallel>], iteration_bounds = array<i64: 1>, scalar_prefetch = 0 : i64, scratch_operands = 0 : i64, tpu.core_type = #tpu.core_type<tc>, window_params = [{transform_indices = @transform_0, window_bounds = array<i64: 2, 64>}, {pipeline_mode = #tpu.pipeline_mode<synchronous>, transform_indices = @transform_1, window_bounds = array<i64: 64, 128>}, {pipeline_mode = #tpu.pipeline_mode<synchronous>, transform_indices = @transform_2, window_bounds = array<i64: 1, 128>}, {pipeline_mode = #tpu.pipeline_mode<synchronous>, transform_indices = @transform_3, window_bounds = array<i64: 128, 128>}, {transform_indices = @transform_4, window_bounds = array<i64: 2, 128>}]} {
    %c0 = arith.constant 0 : index
    %c0_0 = arith.constant 0 : index
    %0 = vector.load %arg1[%c0, %c0_0] : memref<2x64xf32, #tpu.memory_space<vmem>>, vector<2x64xf32>
    %c0_1 = arith.constant 0 : index
    %c0_2 = arith.constant 0 : index
    %1 = vector.load %arg2[%c0_1, %c0_2] : memref<64x128xf32, #tpu.memory_space<vmem>>, vector<64x128xf32>
    %c0_3 = arith.constant 0 : index
    %c0_4 = arith.constant 0 : index
    %2 = vector.load %arg3[%c0_3, %c0_4] : memref<1x128xf32, #tpu.memory_space<vmem>>, vector<1x128xf32>
    %c0_5 = arith.constant 0 : index
    %c0_6 = arith.constant 0 : index
    %3 = vector.load %arg4[%c0_5, %c0_6] : memref<128x128xf32, #tpu.memory_space<vmem>>, vector<128x128xf32>
    %cst = arith.constant dense<0.000000e+00> : vector<2x128xf32>
    %4 = tpu.matmul %0, %1, %cst {dimension_numbers = #tpu.dot_dimension_numbers<[1], [0], [0], [1], [0, 0, 1, 1], [], []>} : vector<2x64xf32>, vector<64x128xf32>, vector<2x128xf32> -> vector<2x128xf32>
    %5 = vector.broadcast %2 : vector<1x128xf32> to vector<2x128xf32>
    %6 = arith.addf %4, %5 : vector<2x128xf32>
    %cst_7 = arith.constant 2.000000e+01 : f32
    %7 = vector.broadcast %cst_7 : f32 to vector<2x128xf32>
    %8 = arith.cmpf ogt, %6, %7 : vector<2x128xf32>
    %cst_8 = arith.constant 0.000000e+00 : f32
    %9 = vector.broadcast %cst_8 : f32 to vector<2x128xf32>
    %10 = arith.select %8, %9, %6 : vector<2x128xi1>, vector<2x128xf32>
    %cst_9 = arith.constant 2.000000e+01 : f32
    %11 = vector.broadcast %cst_9 : f32 to vector<2x128xf32>
    %12 = arith.cmpf ogt, %6, %11 : vector<2x128xf32>
    %13 = math.exp %10 : vector<2x128xf32>
    %14 = math.log1p %13 : vector<2x128xf32>
    %15 = arith.select %12, %6, %14 : vector<2x128xi1>, vector<2x128xf32>
    %cst_10 = arith.constant 2.500000e-09 : f32
    %c0_i32 = arith.constant 0 : i32
    %cst_11 = arith.constant 0x7F800000 : f32
    %16:3 = scf.while (%arg6 = %c0_i32, %arg7 = %15, %arg8 = %cst_11) : (i32, vector<2x128xf32>, f32) -> (i32, vector<2x128xf32>, f32) {
      %c16_i32 = arith.constant 16 : i32
      %24 = arith.cmpi slt, %arg6, %c16_i32 : i32
      %25 = arith.cmpf oge, %arg8, %cst_10 : f32
      %26 = arith.andi %24, %25 : i1
      scf.condition(%26) %arg6, %arg7, %arg8 : i32, vector<2x128xf32>, f32
    } do {
    ^bb0(%arg6: i32, %arg7: vector<2x128xf32>, %arg8: f32):
      %cst_17 = arith.constant dense<0.000000e+00> : vector<2x128xf32>
      %24 = tpu.matmul %arg7, %3, %cst_17 {dimension_numbers = #tpu.dot_dimension_numbers<[1], [0], [0], [1], [0, 0, 1, 1], [], []>} : vector<2x128xf32>, vector<128x128xf32>, vector<2x128xf32> -> vector<2x128xf32>
      %25 = arith.addf %24, %15 : vector<2x128xf32>
      %26 = arith.subf %25, %arg7 : vector<2x128xf32>
      %27 = arith.mulf %26, %26 : vector<2x128xf32>
      %28 = vector.shape_cast %27 : vector<2x128xf32> to vector<1x2x128xf32>
      %cst_18 = arith.constant dense<0.000000e+00> : vector<1xf32>
      %29 = vector.multi_reduction <add>, %28, %cst_18 [1, 2] : vector<1x2x128xf32> to vector<1xf32>
      %30 = vector.shape_cast %29 : vector<1xf32> to vector<1x1x1xf32>
      %31 = vector.extract %30[0, 0, 0] : f32 from vector<1x1x1xf32>
      %cst_19 = arith.constant dense<0.000000e+00> : vector<2x128xf32>
      %32 = tpu.matmul %25, %3, %cst_19 {dimension_numbers = #tpu.dot_dimension_numbers<[1], [0], [0], [1], [0, 0, 1, 1], [], []>} : vector<2x128xf32>, vector<128x128xf32>, vector<2x128xf32> -> vector<2x128xf32>
      %33 = arith.addf %32, %15 : vector<2x128xf32>
      %cst_20 = arith.constant dense<0.000000e+00> : vector<2x128xf32>
      %34 = tpu.matmul %33, %3, %cst_20 {dimension_numbers = #tpu.dot_dimension_numbers<[1], [0], [0], [1], [0, 0, 1, 1], [], []>} : vector<2x128xf32>, vector<128x128xf32>, vector<2x128xf32> -> vector<2x128xf32>
      %35 = arith.addf %34, %15 : vector<2x128xf32>
      %cst_21 = arith.constant dense<0.000000e+00> : vector<2x128xf32>
      %36 = tpu.matmul %35, %3, %cst_21 {dimension_numbers = #tpu.dot_dimension_numbers<[1], [0], [0], [1], [0, 0, 1, 1], [], []>} : vector<2x128xf32>, vector<128x128xf32>, vector<2x128xf32> -> vector<2x128xf32>
      %37 = arith.addf %36, %15 : vector<2x128xf32>
      %cst_22 = arith.constant dense<0.000000e+00> : vector<2x128xf32>
      %38 = tpu.matmul %37, %3, %cst_22 {dimension_numbers = #tpu.dot_dimension_numbers<[1], [0], [0], [1], [0, 0, 1, 1], [], []>} : vector<2x128xf32>, vector<128x128xf32>, vector<2x128xf32> -> vector<2x128xf32>
      %39 = arith.addf %38, %15 : vector<2x128xf32>
      %cst_23 = arith.constant dense<0.000000e+00> : vector<2x128xf32>
      %40 = tpu.matmul %39, %3, %cst_23 {dimension_numbers = #tpu.dot_dimension_numbers<[1], [0], [0], [1], [0, 0, 1, 1], [], []>} : vector<2x128xf32>, vector<128x128xf32>, vector<2x128xf32> -> vector<2x128xf32>
      %41 = arith.addf %40, %15 : vector<2x128xf32>
      %cst_24 = arith.constant dense<0.000000e+00> : vector<2x128xf32>
      %42 = tpu.matmul %41, %3, %cst_24 {dimension_numbers = #tpu.dot_dimension_numbers<[1], [0], [0], [1], [0, 0, 1, 1], [], []>} : vector<2x128xf32>, vector<128x128xf32>, vector<2x128xf32> -> vector<2x128xf32>
      %43 = arith.addf %42, %15 : vector<2x128xf32>
      %cst_25 = arith.constant dense<0.000000e+00> : vector<2x128xf32>
      %44 = tpu.matmul %43, %3, %cst_25 {dimension_numbers = #tpu.dot_dimension_numbers<[1], [0], [0], [1], [0, 0, 1, 1], [], []>} : vector<2x128xf32>, vector<128x128xf32>, vector<2x128xf32> -> vector<2x128xf32>
      %45 = arith.addf %44, %15 : vector<2x128xf32>
      %c1_i32 = arith.constant 1 : i32
      %46 = arith.addi %arg6, %c1_i32 : i32
      scf.yield %46, %45, %31 : i32, vector<2x128xf32>, f32
    }
    %cst_12 = arith.constant dense<0.000000e+00> : vector<2x128xf32>
    %17 = tpu.matmul %16#1, %3, %cst_12 {dimension_numbers = #tpu.dot_dimension_numbers<[1], [0], [0], [1], [0, 0, 1, 1], [], []>} : vector<2x128xf32>, vector<128x128xf32>, vector<2x128xf32> -> vector<2x128xf32>
    %18 = arith.addf %17, %15 : vector<2x128xf32>
    %cst_13 = arith.constant dense<0.000000e+00> : vector<2x128xf32>
    %19 = tpu.matmul %18, %3, %cst_13 {dimension_numbers = #tpu.dot_dimension_numbers<[1], [0], [0], [1], [0, 0, 1, 1], [], []>} : vector<2x128xf32>, vector<128x128xf32>, vector<2x128xf32> -> vector<2x128xf32>
    %20 = arith.addf %19, %15 : vector<2x128xf32>
    %cst_14 = arith.constant dense<0.000000e+00> : vector<2x128xf32>
    %21 = tpu.matmul %20, %3, %cst_14 {dimension_numbers = #tpu.dot_dimension_numbers<[1], [0], [0], [1], [0, 0, 1, 1], [], []>} : vector<2x128xf32>, vector<128x128xf32>, vector<2x128xf32> -> vector<2x128xf32>
    %22 = arith.addf %21, %15 : vector<2x128xf32>
    %c0_15 = arith.constant 0 : index
    %c0_16 = arith.constant 0 : index
    %23 = vector.load %arg5[%c0_15, %c0_16] : memref<2x128xf32, #tpu.memory_space<vmem>>, vector<2x128xf32>
    tpu.vector_store %arg5[%c0_15, %c0_16], %22 {strides = array<i32>} : memref<2x128xf32, #tpu.memory_space<vmem>>, vector<2x128xf32>,
    return
  }
  func.func @transform_0(%arg0: i32) -> (i32, i32) {
    %c0_i32 = arith.constant 0 : i32
    %c0_i32_0 = arith.constant 0 : i32
    return %arg0, %c0_i32 : i32, i32
  }
  func.func @transform_1(%arg0: i32) -> (i32, i32) {
    %c0_i32 = arith.constant 0 : i32
    %c0_i32_0 = arith.constant 0 : i32
    %c0_i32_1 = arith.constant 0 : i32
    return %c0_i32, %c0_i32_0 : i32, i32
  }
  func.func @transform_2(%arg0: i32) -> (i32, i32) {
    %c0_i32 = arith.constant 0 : i32
    %c0_i32_0 = arith.constant 0 : i32
    %c0_i32_1 = arith.constant 0 : i32
    return %c0_i32, %c0_i32_0 : i32, i32
  }
  func.func @transform_3(%arg0: i32) -> (i32, i32) {
    %c0_i32 = arith.constant 0 : i32
    %c0_i32_0 = arith.constant 0 : i32
    %c0_i32_1 = arith.constant 0 : i32
    return %c0_i32, %c0_i32_0 : i32, i32
  }
  func.func @transform_4(%arg0: i32) -> (i32, i32) {
    %c0_i32 = arith.constant 0 : i32
    %c0_i32_0 = arith.constant 0 : i32
    return %arg0, %c0_i32 : i32, i32
  }
}

</mosaic_0001>

<bundles_post_ra>
// kernel: phi_w_fixed.1
= control target key start
LH: loop header
LB: loop body
LE: loop exit
PB: predicated region body
PF: predicated region fallthrough
CT: control target
= control target key end

     0   :  { %v1591_v3 = vmov 0.0   ;;  %vm1592_vm0 = vmmov 0   ;;  %vm49_vm1 = vcmask 523264   ;;  %s2155_s3 = inlined_call_operand.vmem [shape: f32[128,128], index: 3, kind: input, shape index: {}]   ;;  %s2156_s4 = inlined_call_operand.vmem [shape: f32[2,128], index: 4, kind: output, shape index: {}]   ;;  %s2157_s1 = inlined_call_operand.vmem [shape: f32[64,128], index: 1, kind: input, shape index: {}]   ;;  %s2158_s0 = inlined_call_operand.vmem [shape: f32[2,64], index: 0, kind: input, shape index: {}]   ;;  %s2159_s2 = inlined_call_operand.vmem [shape: f32[1,128], index: 2, kind: input, shape index: {}]  }
   0x1   :  { %v1623_v0 = vld [vmem:[%s2155_s3] sm:$0xff]  ;;  %v1628_v1 = vld [vmem:[%s2155_s3 + $0x8] sm:$0xff]  ;;  %v1633_v2 = vld [vmem:[%s2155_s3 + $0x10] sm:$0xff]  ;;  %1145 = vmatprep.subr.mxu0 %v1591_v3  ;;  %1161 = vmatprep.mubr.msk.f32.mxu0 %vm1592_vm0, %v1591_v3 }
   0x2   :  { %v1641_v4 = vld [vmem:[%s2155_s3 + $0x18] sm:$0xff]  ;;  %v1646_v5 = vld [vmem:[%s2155_s3 + $0x20] sm:$0xff]  ;;  %v1651_v6 = vld [vmem:[%s2155_s3 + $0x28] sm:$0xff] }
   0x3   :  { %v1656_v7 = vld [vmem:[%s2155_s3 + $0x30] sm:$0xff]  ;;  %v1661_v8 = vld [vmem:[%s2155_s3 + $0x38] sm:$0xff]  ;;  %v1666_v9 = vld [vmem:[%s2155_s3 + $0x40] sm:$0xff] }
   0x4   :  { %v1671_v10 = vld [vmem:[%s2155_s3 + $0x48] sm:$0xff]  ;;  %v1676_v11 = vld [vmem:[%s2155_s3 + $0x50] sm:$0xff]  ;;  %v1681_v12 = vld [vmem:[%s2155_s3 + $0x58] sm:$0xff] }
   0x5   :  { %v1686_v13 = vld [vmem:[%s2155_s3 + $0x60] sm:$0xff]  ;;  %v1691_v14 = vld [vmem:[%s2155_s3 + $0x68] sm:$0xff]  ;;  %v1696_v15 = vld [vmem:[%s2155_s3 + $0x70] sm:$0xff] }
   0x6   :  { %v1701_v16 = vld [vmem:[%s2155_s3 + $0x78] sm:$0xff]  ;;  %v24_v18 = vld [vmem:[%s2157_s1 + $0x30] sm:$0xff]  ;;  %v23_v19 = vld [vmem:[%s2157_s1 + $0x28] sm:$0xff] }
   0x7   :  { %v25_v17 = vld [vmem:[%s2157_s1 + $0x38] sm:$0xff]  ;;  %v22_v20 = vld [vmem:[%s2157_s1 + $0x20] sm:$0xff]  ;;  %v20_v22 = vld [vmem:[%s2157_s1 + $0x10] sm:$0xff] }
   0x8   :  { %1146 = vmatpush3.msra.mxu0 %v25_v17  ;;  %v21_v21 = vld [vmem:[%s2157_s1 + $0x18] sm:$0xff]  ;;  %v19_v23 = vld [vmem:[%s2157_s1 + $0x8] sm:$0xff]  ;;  %v18_v24 = vld [vmem:[%s2157_s1] sm:$0xff] }
   0x9   :  { %1147 = vmatprep.subr.mxu0 %v1591_v3  ;;  %v17_v25 = vld [vmem:[%s2158_s0] sm:$0x3]  ;;  %s1745_s0 = smov 0  }
   0xa   :  { %1148 = vmatpush3.msra.mxu0 %v24_v18  ;;  %v947_v26 = vld [vmem:[%s2159_s2] ss:$0 sm:$0xff] }
   0xb   :  { %1149 = vmatprep.subr.mxu0 %v1591_v3 }
   0xc   :  { %1150 = vmatpush3.msra.mxu0 %v23_v19 }
   0xd   :  { %1151 = vmatprep.subr.mxu0 %v1591_v3 }
   0xe   :  { %1152 = vmatpush3.msra.mxu0 %v22_v20 }
   0xf   :  { %1153 = vmatprep.subr.mxu0 %v1591_v3 }
  0x10   :  { %1154 = vmatpush3.msra.mxu0 %v21_v21 }
  0x11   :  { %1155 = vmatprep.subr.mxu0 %v1591_v3 }
  0x12   :  { %1156 = vmatpush3.msra.mxu0 %v20_v22 }
  0x13   :  { %1157 = vmatprep.subr.mxu0 %v1591_v3 }
  0x14   :  { %1158 = vmatpush3.msra.mxu0 %v19_v23 }
  0x15   :  { %1159 = vmatprep.subr.mxu0 %v1591_v3 }
  0x16   :  { %1160 = vmatpush3.msra.mxu0 %v18_v24 }
  0x17   :  { %1162 = vmatmul.mubr.msk.f32.vlgmr.msra.gmra.mxu0 %vm49_vm1, %v17_v25 }
  0xd7   :  { %v119_v27 = vpop.f32.mrf.mxu0 }
  0xd8   :  { %v120_v28 = vadd.f32 %v947_v26, %v119_v27 }
  0xd9   :  { %v1163_v29 = vpop.f32.mrf.mxu0 }
  0xda   :  { %vm123_vm2 = vcmp.gt.f32.partialorder %v120_v28, 20.0 }
  0xdb   :  { %v124_v30 = vsel %vm123_vm2, 0.0, %v120_v28 }
  0xdc   :  { %v125_v31 = vmul.f32 1.442695, %v124_v30 }
  0xde   :  { %1571 = vpow2.f32 %v125_v31 }
  0xeb   :  { %v1572_v32 = vpop.eup %1571 }
  0xec   :  { %v127_v33 = vadd.f32 1.0, %v1572_v32  ;;  %v130_v34 = vmul.f32 -0.5, %v1572_v32  ;;  %v133_v36 = vand.u32 2147483647, %v1572_v32 }
  0xee   :  { %1573 = vlog2.f32 %v127_v33  ;;  %v131_v35 = vadd.f32 1.0, %v130_v34  ;;  %vm134_vm3 = vcmp.lt.f32.partialorder %v133_v36, 0.0004427343 }
  0xf0   :  { %v132_v39 = vmul.f32 %v1572_v32, %v131_v35 }
  0xfb   :  { %v1574_v37 = vpop.eup %1573 }
  0xfc   :  { %v129_v38 = vmul.f32 0.6931472, %v1574_v37 }
  0xfe   :  { %v135_v40 = vsel %vm134_vm3, %v132_v39, %v129_v38 }
  0xff   :  { %v1740_v41 = vsel %vm123_vm2, %v120_v28, %v135_v40  }
 0x100   :  { %v2160_v42 = vmov %v1740_v41 }
 0x101 LB: > { %v1593_v43 = vmov 0.0   ;;  %vm1594_vm4 = vmmov 0   ;;  %vm219_vm5 = vcmask 1041408   ;;  %s720_s0 = sadd.s32 1, %s1589_s0   ;;  %s1589_s0 = sphi %s1745_s0, %s720_s0   ;;  %v1585_v42 = vphi %v2160_v42, %v2162_v42  }
 0x102   : > { %1164 = vmatprep.subr.mxu0 %v1593_v43  ;;  %1196 = vmatprep.mubr.msk.f32.mxu0 %vm1594_vm4, %v1593_v43  ;;  %p141_p0 = scmp.lt.s32.totalorder %s720_s0, 16 }
 0x103   : > { %1165 = vmatpush3.msra.mxu0 %v1701_v16  ;;  %1199 = vmatprep.subr.mxu1 %v1593_v43 }
 0x104   : > { %1166 = vmatprep.subr.mxu0 %v1593_v43  ;;  %1200 = vmatpush3.msra.mxu1 %v1701_v16 }
 0x105   : > { %1167 = vmatpush3.msra.mxu0 %v1696_v15  ;;  %1201 = vmatprep.subr.mxu1 %v1593_v43 }
 0x106   : > { %1168 = vmatprep.subr.mxu0 %v1593_v43  ;;  %1202 = vmatpush3.msra.mxu1 %v1696_v15 }
 0x107   : > { %1169 = vmatpush3.msra.mxu0 %v1691_v14  ;;  %1203 = vmatprep.subr.mxu1 %v1593_v43 }
 0x108   : > { %1170 = vmatprep.subr.mxu0 %v1593_v43  ;;  %1204 = vmatpush3.msra.mxu1 %v1691_v14 }
 0x109   : > { %1171 = vmatpush3.msra.mxu0 %v1686_v13  ;;  %1205 = vmatprep.subr.mxu1 %v1593_v43 }
 0x10a   : > { %1172 = vmatprep.subr.mxu0 %v1593_v43  ;;  %1206 = vmatpush3.msra.mxu1 %v1686_v13 }
 0x10b   : > { %1173 = vmatpush3.msra.mxu0 %v1681_v12  ;;  %1207 = vmatprep.subr.mxu1 %v1593_v43 }
 0x10c   : > { %1174 = vmatprep.subr.mxu0 %v1593_v43  ;;  %1208 = vmatpush3.msra.mxu1 %v1681_v12 }
 0x10d   : > { %1175 = vmatpush3.msra.mxu0 %v1676_v11  ;;  %1209 = vmatprep.subr.mxu1 %v1593_v43 }
 0x10e   : > { %1176 = vmatprep.subr.mxu0 %v1593_v43  ;;  %1210 = vmatpush3.msra.mxu1 %v1676_v11 }
 0x10f   : > { %1177 = vmatpush3.msra.mxu0 %v1671_v10  ;;  %1211 = vmatprep.subr.mxu1 %v1593_v43 }
 0x110   : > { %1178 = vmatprep.subr.mxu0 %v1593_v43  ;;  %1212 = vmatpush3.msra.mxu1 %v1671_v10 }
 0x111   : > { %1179 = vmatpush3.msra.mxu0 %v1666_v9  ;;  %1213 = vmatprep.subr.mxu1 %v1593_v43 }
 0x112   : > { %1180 = vmatprep.subr.mxu0 %v1593_v43  ;;  %1214 = vmatpush3.msra.mxu1 %v1666_v9 }
 0x113   : > { %1181 = vmatpush3.msra.mxu0 %v1661_v8  ;;  %1215 = vmatprep.subr.mxu1 %v1593_v43 }
 0x114   : > { %1182 = vmatprep.subr.mxu0 %v1593_v43  ;;  %1216 = vmatpush3.msra.mxu1 %v1661_v8 }
 0x115   : > { %1183 = vmatpush3.msra.mxu0 %v1656_v7  ;;  %1217 = vmatprep.subr.mxu1 %v1593_v43 }
 0x116   : > { %1184 = vmatprep.subr.mxu0 %v1593_v43  ;;  %1218 = vmatpush3.msra.mxu1 %v1656_v7 }
 0x117   : > { %1185 = vmatpush3.msra.mxu0 %v1651_v6  ;;  %1219 = vmatprep.subr.mxu1 %v1593_v43 }
 0x118   : > { %1186 = vmatprep.subr.mxu0 %v1593_v43  ;;  %1220 = vmatpush3.msra.mxu1 %v1651_v6 }
 0x119   : > { %1187 = vmatpush3.msra.mxu0 %v1646_v5  ;;  %1221 = vmatprep.subr.mxu1 %v1593_v43 }
 0x11a   : > { %1188 = vmatprep.subr.mxu0 %v1593_v43  ;;  %1222 = vmatpush3.msra.mxu1 %v1646_v5 }
 0x11b   : > { %1189 = vmatpush3.msra.mxu0 %v1641_v4  ;;  %1223 = vmatprep.subr.mxu1 %v1593_v43 }
 0x11c   : > { %1190 = vmatprep.subr.mxu0 %v1593_v43  ;;  %1224 = vmatpush3.msra.mxu1 %v1641_v4 }
 0x11d   : > { %1191 = vmatpush3.msra.mxu0 %v1633_v2  ;;  %1225 = vmatprep.subr.mxu1 %v1593_v43 }
 0x11e   : > { %1192 = vmatprep.subr.mxu0 %v1593_v43  ;;  %1226 = vmatpush3.msra.mxu1 %v1633_v2 }
 0x11f   : > { %1193 = vmatpush3.msra.mxu0 %v1628_v1  ;;  %1227 = vmatprep.subr.mxu1 %v1593_v43 }
 0x120   : > { %1194 = vmatprep.subr.mxu0 %v1593_v43  ;;  %1228 = vmatpush3.msra.mxu1 %v1628_v1 }
 0x121   : > { %1195 = vmatpush3.msra.mxu0 %v1623_v0  ;;  %1229 = vmatprep.subr.mxu1 %v1593_v43 }
 0x122   : > { %1197 = vmatmul.mubr.f32.vlgmr.msra.gmra.mxu0 %v1585_v42  ;;  %1230 = vmatpush3.msra.mxu1 %v1623_v0 }
 0x123   : > { %1231 = vmatprep.mubr.msk.f32.mxu1 %vm1594_vm4, %v1593_v43  ;;  %1234 = vmatprep.subr.mxu0 %v1593_v43 }
 0x124   : > { %1235 = vmatpush3.msra.mxu0 %v1701_v16  ;;  %1266 = vmatprep.mubr.msk.f32.mxu0 %vm1594_vm4, %v1593_v43 }
 0x125   : > { %1236 = vmatprep.subr.mxu0 %v1593_v43  ;;  %1269 = vmatprep.subr.mxu1 %v1593_v43 }
 0x126   : > { %1237 = vmatpush3.msra.mxu0 %v1696_v15 }
 0x127   : > { %1238 = vmatprep.subr.mxu0 %v1593_v43 }
 0x128   : > { %1239 = vmatpush3.msra.mxu0 %v1691_v14 }
 0x129   : > { %1240 = vmatprep.subr.mxu0 %v1593_v43 }
 0x12a   : > { %1241 = vmatpush3.msra.mxu0 %v1686_v13 }
 0x12b   : > { %1242 = vmatprep.subr.mxu0 %v1593_v43 }
 0x12c   : > { %1243 = vmatpush3.msra.mxu0 %v1681_v12 }
 0x12d   : > { %1244 = vmatprep.subr.mxu0 %v1593_v43 }
 0x12e   : > { %1245 = vmatpush3.msra.mxu0 %v1676_v11 }
 0x12f   : > { %1246 = vmatprep.subr.mxu0 %v1593_v43 }
 0x130   : > { %1247 = vmatpush3.msra.mxu0 %v1671_v10 }
 0x131   : > { %1248 = vmatprep.subr.mxu0 %v1593_v43 }
 0x132   : > { %1249 = vmatpush3.msra.mxu0 %v1666_v9 }
 0x133   : > { %1250 = vmatprep.subr.mxu0 %v1593_v43 }
 0x134   : > { %1251 = vmatpush3.msra.mxu0 %v1661_v8 }
 0x135   : > { %1252 = vmatprep.subr.mxu0 %v1593_v43 }
 0x136   : > { %1253 = vmatpush3.msra.mxu0 %v1656_v7 }
 0x137   : > { %1254 = vmatprep.subr.mxu0 %v1593_v43 }
 0x138   : > { %1255 = vmatpush3.msra.mxu0 %v1651_v6 }
 0x139   : > { %1256 = vmatprep.subr.mxu0 %v1593_v43 }
 0x13a   : > { %1257 = vmatpush3.msra.mxu0 %v1646_v5 }
 0x13b   : > { %1258 = vmatprep.subr.mxu0 %v1593_v43 }
 0x13c   : > { %1259 = vmatpush3.msra.mxu0 %v1641_v4 }
 0x13d   : > { %1260 = vmatprep.subr.mxu0 %v1593_v43 }
 0x13e   : > { %1261 = vmatpush3.msra.mxu0 %v1633_v2 }
 0x13f   : > { %1262 = vmatprep.subr.mxu0 %v1593_v43 }
 0x140   : > { %1263 = vmatpush3.msra.mxu0 %v1628_v1 }
 0x141   : > { %1264 = vmatprep.subr.mxu0 %v1593_v43 }
 0x142   : > { %1265 = vmatpush3.msra.mxu0 %v1623_v0 }
 0x143   : > { %1304 = vmatprep.subr.mxu0 %v1593_v43 }
 0x1e2   : > { %v213_v44 = vpop.f32.mrf.mxu0 }
 0x1e3   : > { %v214_v45 = vadd.f32 %v213_v44, %v1740_v41 }
 0x1e4   : > { %v1198_v46 = vpop.f32.mrf.mxu0 }
 0x1e5   : > { %1232 = vmatmul.mubr.f32.vlgmr.msra.gmra.mxu1 %v214_v45  ;;  %v217_v47 = vsub.f32 %v214_v45, %v1585_v42 }
 0x1e6   : > { %1270 = vmatpush3.msra.mxu1 %v1701_v16  ;;  %1301 = vmatprep.mubr.msk.f32.mxu1 %vm1594_vm4, %v1593_v43 }
 0x1e7   : > { %v218_v48 = vmul.f32 %v217_v47, %v217_v47  ;;  %1271 = vmatprep.subr.mxu1 %v1593_v43 }
 0x1e8   : > { %1272 = vmatpush3.msra.mxu1 %v1696_v15 }
 0x1e9   : > { %v220_v49 = vsel %vm219_vm5, %v218_v48, 0.0  ;;  %1273 = vmatprep.subr.mxu1 %v1593_v43 }
 0x1ea   : > { %221 = vadd.xlane.f32.xlu0 %v220_v49  ;;  %1274 = vmatpush3.msra.mxu1 %v1691_v14 }
 0x1eb   : > { %1275 = vmatprep.subr.mxu1 %v1593_v43 }
 0x1ec   : > { %1276 = vmatpush3.msra.mxu1 %v1686_v13 }
 0x1ed   : > { %1277 = vmatprep.subr.mxu1 %v1593_v43 }
 0x1ee   : > { %1278 = vmatpush3.msra.mxu1 %v1681_v12 }
 0x1ef   : > { %1279 = vmatprep.subr.mxu1 %v1593_v43 }
 0x1f0   : > { %1280 = vmatpush3.msra.mxu1 %v1676_v11 }
 0x1f1   : > { %1281 = vmatprep.subr.mxu1 %v1593_v43 }
 0x1f2   : > { %1282 = vmatpush3.msra.mxu1 %v1671_v10 }
 0x1f3   : > { %1283 = vmatprep.subr.mxu1 %v1593_v43 }
 0x1f4   : > { %1284 = vmatpush3.msra.mxu1 %v1666_v9 }
 0x1f5   : > { %1285 = vmatprep.subr.mxu1 %v1593_v43 }
 0x1f6   : > { %1286 = vmatpush3.msra.mxu1 %v1661_v8 }
 0x1f7   : > { %1287 = vmatprep.subr.mxu1 %v1593_v43 }
 0x1f8   : > { %1288 = vmatpush3.msra.mxu1 %v1656_v7 }
 0x1f9   : > { %1289 = vmatprep.subr.mxu1 %v1593_v43 }
 0x1fa   : > { %1290 = vmatpush3.msra.mxu1 %v1651_v6 }
 0x1fb   : > { %1291 = vmatprep.subr.mxu1 %v1593_v43 }
 0x1fc   : > { %1292 = vmatpush3.msra.mxu1 %v1646_v5 }
 0x1fd   : > { %1293 = vmatprep.subr.mxu1 %v1593_v43 }
 0x1fe   : > { %1294 = vmatpush3.msra.mxu1 %v1641_v4 }
 0x1ff   : > { %1295 = vmatprep.subr.mxu1 %v1593_v43 }
 0x200   : > { %1296 = vmatpush3.msra.mxu1 %v1633_v2 }
 0x201   : > { %1297 = vmatprep.subr.mxu1 %v1593_v43 }
 0x202   : > { %1298 = vmatpush3.msra.mxu1 %v1628_v1 }
 0x203   : > { %1299 = vmatprep.subr.mxu1 %v1593_v43 }
 0x204   : > { %1300 = vmatpush3.msra.mxu1 %v1623_v0 }
 0x205   : > { %1339 = vmatprep.subr.mxu1 %v1593_v43 }
 0x273   : > { %v222_v50 = vpop.xlane.xlu0 %221 }
 0x274   : > { %v223_v51 = vrot.slane %v222_v50, 4 }
 0x276   : > { %v224_v52 = vadd.f32 %v223_v51, %v222_v50 }
 0x278   : > { %v225_v53 = vrot.slane %v224_v52, 2 }
 0x27a   : > { %v226_v54 = vadd.f32 %v225_v53, %v224_v52 }
 0x27c   : > { %v227_v55 = vrot.slane %v226_v54, 1 }
 0x27e   : > { %v228_v56 = vadd.f32 %v227_v55, %v226_v54 }
 0x280   : > { %1549 = vpush %v228_v56 }
 0x2a5   : > { %v296_v57 = vpop.f32.mrf.mxu1 }
 0x2a6   : > { %v297_v58 = vadd.f32 %v296_v57, %v1740_v41 }
 0x2a7   : > { %v1233_v59 = vpop.f32.mrf.mxu1 }
 0x2a8   : > { %1267 = vmatmul.mubr.f32.vlgmr.msra.gmra.mxu0 %v297_v58 }
 0x2a9   : > { %1305 = vmatpush3.msra.mxu0 %v1701_v16  ;;  %1336 = vmatprep.mubr.msk.f32.mxu0 %vm1594_vm4, %v1593_v43 }
 0x2aa   : > { %1306 = vmatprep.subr.mxu0 %v1593_v43 }
 0x2ab   : > { %1307 = vmatpush3.msra.mxu0 %v1696_v15 }
 0x2ac   : > { %1308 = vmatprep.subr.mxu0 %v1593_v43 }
 0x2ad   : > { %1309 = vmatpush3.msra.mxu0 %v1691_v14 }
 0x2ae   : > { %1310 = vmatprep.subr.mxu0 %v1593_v43 }
 0x2af   : > { %1311 = vmatpush3.msra.mxu0 %v1686_v13 }
 0x2b0   : > { %1312 = vmatprep.subr.mxu0 %v1593_v43 }
 0x2b1   : > { %s1905_s1 = spop %1549  ;;  %1313 = vmatpush3.msra.mxu0 %v1681_v12 }
 0x2b2   : > { %1314 = vmatprep.subr.mxu0 %v1593_v43  ;;  %p142_p1 = scmp.ge.f32.partialorder %s1905_s1, 2.5e-09 }
 0x2b3   : > { %1315 = vmatpush3.msra.mxu0 %v1676_v11 }
 0x2b4   : > { %1316 = vmatprep.subr.mxu0 %v1593_v43  ;;  %p143_p2 = pnand %p142_p1, %p141_p0 }
 0x2b5   : > { %1317 = vmatpush3.msra.mxu0 %v1671_v10 }
 0x2b6   : > { %1318 = vmatprep.subr.mxu0 %v1593_v43 }
 0x2b7   : > { %1319 = vmatpush3.msra.mxu0 %v1666_v9 }
 0x2b8   : > { %1320 = vmatprep.subr.mxu0 %v1593_v43 }
 0x2b9   : > { %1321 = vmatpush3.msra.mxu0 %v1661_v8 }
 0x2ba   : > { %1322 = vmatprep.subr.mxu0 %v1593_v43 }
 0x2bb   : > { %1323 = vmatpush3.msra.mxu0 %v1656_v7 }
 0x2bc   : > { %1324 = vmatprep.subr.mxu0 %v1593_v43 }
 0x2bd   : > { %1325 = vmatpush3.msra.mxu0 %v1651_v6 }
 0x2be   : > { %1326 = vmatprep.subr.mxu0 %v1593_v43 }
 0x2bf   : > { %1327 = vmatpush3.msra.mxu0 %v1646_v5 }
 0x2c0   : > { %1328 = vmatprep.subr.mxu0 %v1593_v43 }
 0x2c1   : > { %1329 = vmatpush3.msra.mxu0 %v1641_v4 }
 0x2c2   : > { %1330 = vmatprep.subr.mxu0 %v1593_v43 }
 0x2c3   : > { %1331 = vmatpush3.msra.mxu0 %v1633_v2 }
 0x2c4   : > { %1332 = vmatprep.subr.mxu0 %v1593_v43 }
 0x2c5   : > { %1333 = vmatpush3.msra.mxu0 %v1628_v1 }
 0x2c6   : > { %1334 = vmatprep.subr.mxu0 %v1593_v43 }
 0x2c7   : > { %1335 = vmatpush3.msra.mxu0 %v1623_v0 }
 0x2c8   : > { %1374 = vmatprep.subr.mxu0 %v1593_v43 }
 0x368   : > { %v366_v60 = vpop.f32.mrf.mxu0 }
 0x369   : > { %v367_v61 = vadd.f32 %v366_v60, %v1740_v41 }
 0x36a   : > { %v1268_v62 = vpop.f32.mrf.mxu0 }
 0x36b   : > { %1302 = vmatmul.mubr.f32.vlgmr.msra.gmra.mxu1 %v367_v61 }
 0x36c   : > { %1340 = vmatpush3.msra.mxu1 %v1701_v16  ;;  %1371 = vmatprep.mubr.msk.f32.mxu1 %vm1594_vm4, %v1593_v43 }
 0x36d   : > { %1341 = vmatprep.subr.mxu1 %v1593_v43 }
 0x36e   : > { %1342 = vmatpush3.msra.mxu1 %v1696_v15 }
 0x36f   : > { %1343 = vmatprep.subr.mxu1 %v1593_v43 }
 0x370   : > { %1344 = vmatpush3.msra.mxu1 %v1691_v14 }
 0x371   : > { %1345 = vmatprep.subr.mxu1 %v1593_v43 }
 0x372   : > { %1346 = vmatpush3.msra.mxu1 %v1686_v13 }
 0x373   : > { %1347 = vmatprep.subr.mxu1 %v1593_v43 }
 0x374   : > { %1348 = vmatpush3.msra.mxu1 %v1681_v12 }
 0x375   : > { %1349 = vmatprep.subr.mxu1 %v1593_v43 }
 0x376   : > { %1350 = vmatpush3.msra.mxu1 %v1676_v11 }
 0x377   : > { %1351 = vmatprep.subr.mxu1 %v1593_v43 }
 0x378   : > { %1352 = vmatpush3.msra.mxu1 %v1671_v10 }
 0x379   : > { %1353 = vmatprep.subr.mxu1 %v1593_v43 }
 0x37a   : > { %1354 = vmatpush3.msra.mxu1 %v1666_v9 }
 0x37b   : > { %1355 = vmatprep.subr.mxu1 %v1593_v43 }
 0x37c   : > { %1356 = vmatpush3.msra.mxu1 %v1661_v8 }
 0x37d   : > { %1357 = vmatprep.subr.mxu1 %v1593_v43 }
 0x37e   : > { %1358 = vmatpush3.msra.mxu1 %v1656_v7 }
 0x37f   : > { %1359 = vmatprep.subr.mxu1 %v1593_v43 }
 0x380   : > { %1360 = vmatpush3.msra.mxu1 %v1651_v6 }
 0x381   : > { %1361 = vmatprep.subr.mxu1 %v1593_v43 }
 0x382   : > { %1362 = vmatpush3.msra.mxu1 %v1646_v5 }
 0x383   : > { %1363 = vmatprep.subr.mxu1 %v1593_v43 }
 0x384   : > { %1364 = vmatpush3.msra.mxu1 %v1641_v4 }
 0x385   : > { %1365 = vmatprep.subr.mxu1 %v1593_v43 }
 0x386   : > { %1366 = vmatpush3.msra.mxu1 %v1633_v2 }
 0x387   : > { %1367 = vmatprep.subr.mxu1 %v1593_v43 }
 0x388   : > { %1368 = vmatpush3.msra.mxu1 %v1628_v1 }
 0x389   : > { %1369 = vmatprep.subr.mxu1 %v1593_v43 }
 0x38a   : > { %1370 = vmatpush3.msra.mxu1 %v1623_v0 }
 0x38b   : > { %1409 = vmatprep.subr.mxu1 %v1593_v43 }
 0x42b   : > { %v436_v63 = vpop.f32.mrf.mxu1 }
 0x42c   : > { %v437_v17 = vadd.f32 %v436_v63, %v1740_v41 }
 0x42d   : > { %v1303_v18 = vpop.f32.mrf.mxu1 }
 0x42e   : > { %1337 = vmatmul.mubr.f32.vlgmr.msra.gmra.mxu0 %v437_v17 }
 0x42f   : > { %1375 = vmatpush3.msra.mxu0 %v1701_v16  ;;  %1406 = vmatprep.mubr.msk.f32.mxu0 %vm1594_vm4, %v1593_v43 }
 0x430   : > { %1376 = vmatprep.subr.mxu0 %v1593_v43 }
 0x431   : > { %1377 = vmatpush3.msra.mxu0 %v1696_v15 }
 0x432   : > { %1378 = vmatprep.subr.mxu0 %v1593_v43 }
 0x433   : > { %1379 = vmatpush3.msra.mxu0 %v1691_v14 }
 0x434   : > { %1380 = vmatprep.subr.mxu0 %v1593_v43 }
 0x435   : > { %1381 = vmatpush3.msra.mxu0 %v1686_v13 }
 0x436   : > { %1382 = vmatprep.subr.mxu0 %v1593_v43 }
 0x437   : > { %1383 = vmatpush3.msra.mxu0 %v1681_v12 }
 0x438   : > { %1384 = vmatprep.subr.mxu0 %v1593_v43 }
 0x439   : > { %1385 = vmatpush3.msra.mxu0 %v1676_v11 }
 0x43a   : > { %1386 = vmatprep.subr.mxu0 %v1593_v43 }
 0x43b   : > { %1387 = vmatpush3.msra.mxu0 %v1671_v10 }
 0x43c   : > { %1388 = vmatprep.subr.mxu0 %v1593_v43 }
 0x43d   : > { %1389 = vmatpush3.msra.mxu0 %v1666_v9 }
 0x43e   : > { %1390 = vmatprep.subr.mxu0 %v1593_v43 }
 0x43f   : > { %1391 = vmatpush3.msra.mxu0 %v1661_v8 }
 0x440   : > { %1392 = vmatprep.subr.mxu0 %v1593_v43 }
 0x441   : > { %1393 = vmatpush3.msra.mxu0 %v1656_v7 }
 0x442   : > { %1394 = vmatprep.subr.mxu0 %v1593_v43 }
 0x443   : > { %1395 = vmatpush3.msra.mxu0 %v1651_v6 }
 0x444   : > { %1396 = vmatprep.subr.mxu0 %v1593_v43 }
 0x445   : > { %1397 = vmatpush3.msra.mxu0 %v1646_v5 }
 0x446   : > { %1398 = vmatprep.subr.mxu0 %v1593_v43 }
 0x447   : > { %1399 = vmatpush3.msra.mxu0 %v1641_v4 }
 0x448   : > { %1400 = vmatprep.subr.mxu0 %v1593_v43 }
 0x449   : > { %1401 = vmatpush3.msra.mxu0 %v1633_v2 }
 0x44a   : > { %1402 = vmatprep.subr.mxu0 %v1593_v43 }
 0x44b   : > { %1403 = vmatpush3.msra.mxu0 %v1628_v1 }
 0x44c   : > { %1404 = vmatprep.subr.mxu0 %v1593_v43 }
 0x44d   : > { %1405 = vmatpush3.msra.mxu0 %v1623_v0 }
 0x44e   :  { %1444 = vmatprep.subr.mxu0 (%p143_p2), %v1591_v3 }
 0x4ee   : > { %v506_v19 = vpop.f32.mrf.mxu0 }
 0x4ef   : > { %v507_v20 = vadd.f32 %v506_v19, %v1740_v41 }
 0x4f0   : > { %v1338_v21 = vpop.f32.mrf.mxu0 }
 0x4f1   : > { %1372 = vmatmul.mubr.f32.vlgmr.msra.gmra.mxu1 %v507_v20 }
 0x4f2   : > { %1410 = vmatpush3.msra.mxu1 %v1701_v16  ;;  %1441 = vmatprep.mubr.msk.f32.mxu1 %vm1594_vm4, %v1593_v43 }
 0x4f3   : > { %1411 = vmatprep.subr.mxu1 %v1593_v43 }
 0x4f4   : > { %1412 = vmatpush3.msra.mxu1 %v1696_v15 }
 0x4f5   : > { %1413 = vmatprep.subr.mxu1 %v1593_v43 }
 0x4f6   : > { %1414 = vmatpush3.msra.mxu1 %v1691_v14 }
 0x4f7   : > { %1415 = vmatprep.subr.mxu1 %v1593_v43 }
 0x4f8   : > { %1416 = vmatpush3.msra.mxu1 %v1686_v13 }
 0x4f9   : > { %1417 = vmatprep.subr.mxu1 %v1593_v43 }
 0x4fa   : > { %1418 = vmatpush3.msra.mxu1 %v1681_v12 }
 0x4fb   : > { %1419 = vmatprep.subr.mxu1 %v1593_v43 }
 0x4fc   : > { %1420 = vmatpush3.msra.mxu1 %v1676_v11 }
 0x4fd   : > { %1421 = vmatprep.subr.mxu1 %v1593_v43 }
 0x4fe   : > { %1422 = vmatpush3.msra.mxu1 %v1671_v10 }
 0x4ff   : > { %1423 = vmatprep.subr.mxu1 %v1593_v43 }
 0x500   : > { %1424 = vmatpush3.msra.mxu1 %v1666_v9 }
 0x501   : > { %1425 = vmatprep.subr.mxu1 %v1593_v43 }
 0x502   : > { %1426 = vmatpush3.msra.mxu1 %v1661_v8 }
 0x503   : > { %1427 = vmatprep.subr.mxu1 %v1593_v43 }
 0x504   : > { %1428 = vmatpush3.msra.mxu1 %v1656_v7 }
 0x505   : > { %1429 = vmatprep.subr.mxu1 %v1593_v43 }
 0x506   : > { %1430 = vmatpush3.msra.mxu1 %v1651_v6 }
 0x507   : > { %1431 = vmatprep.subr.mxu1 %v1593_v43 }
 0x508   : > { %1432 = vmatpush3.msra.mxu1 %v1646_v5 }
 0x509   : > { %1433 = vmatprep.subr.mxu1 %v1593_v43 }
 0x50a   : > { %1434 = vmatpush3.msra.mxu1 %v1641_v4 }
 0x50b   : > { %1435 = vmatprep.subr.mxu1 %v1593_v43 }
 0x50c   : > { %1436 = vmatpush3.msra.mxu1 %v1633_v2 }
 0x50d   : > { %1437 = vmatprep.subr.mxu1 %v1593_v43 }
 0x50e   : > { %1438 = vmatpush3.msra.mxu1 %v1628_v1 }
 0x50f   : > { %1439 = vmatprep.subr.mxu1 %v1593_v43 }
 0x510   : > { %1440 = vmatpush3.msra.mxu1 %v1623_v0 }
 0x511   :  { %1479 = vmatprep.subr.mxu1 (%p143_p2), %v1591_v3 }
 0x5b1   : > { %v576_v22 = vpop.f32.mrf.mxu1 }
 0x5b2   : > { %v577_v23 = vadd.f32 %v576_v22, %v1740_v41 }
 0x5b3   : > { %v1373_v24 = vpop.f32.mrf.mxu1 }
 0x5b4   : > { %1407 = vmatmul.mubr.f32.vlgmr.msra.gmra.mxu0 %v577_v23 }
 0x5b5   :  { %1476 = vmatprep.mubr.msk.f32.mxu0 (%p143_p2), %vm1592_vm0, %v1591_v3  ;;  %1445 = vmatpush3.msra.mxu0 (%p143_p2), %v1701_v16 }
 0x5b6   :  { %1446 = vmatprep.subr.mxu0 (%p143_p2), %v1591_v3 }
 0x5b7   :  { %1447 = vmatpush3.msra.mxu0 (%p143_p2), %v1696_v15 }
 0x5b8   :  { %1448 = vmatprep.subr.mxu0 (%p143_p2), %v1591_v3 }
 0x5b9   :  { %1449 = vmatpush3.msra.mxu0 (%p143_p2), %v1691_v14 }
 0x5ba   :  { %1450 = vmatprep.subr.mxu0 (%p143_p2), %v1591_v3 }
 0x5bb   :  { %1451 = vmatpush3.msra.mxu0 (%p143_p2), %v1686_v13 }
 0x5bc   :  { %1452 = vmatprep.subr.mxu0 (%p143_p2), %v1591_v3 }
 0x5bd   :  { %1453 = vmatpush3.msra.mxu0 (%p143_p2), %v1681_v12 }
 0x5be   :  { %1454 = vmatprep.subr.mxu0 (%p143_p2), %v1591_v3 }
 0x5bf   :  { %1455 = vmatpush3.msra.mxu0 (%p143_p2), %v1676_v11 }
 0x5c0   :  { %1456 = vmatprep.subr.mxu0 (%p143_p2), %v1591_v3 }
 0x5c1   :  { %1457 = vmatpush3.msra.mxu0 (%p143_p2), %v1671_v10 }
 0x5c2   :  { %1458 = vmatprep.subr.mxu0 (%p143_p2), %v1591_v3 }
 0x5c3   :  { %1459 = vmatpush3.msra.mxu0 (%p143_p2), %v1666_v9 }
 0x5c4   :  { %1460 = vmatprep.subr.mxu0 (%p143_p2), %v1591_v3 }
 0x5c5   :  { %1461 = vmatpush3.msra.mxu0 (%p143_p2), %v1661_v8 }
 0x5c6   :  { %1462 = vmatprep.subr.mxu0 (%p143_p2), %v1591_v3 }
 0x5c7   :  { %1463 = vmatpush3.msra.mxu0 (%p143_p2), %v1656_v7 }
 0x5c8   :  { %1464 = vmatprep.subr.mxu0 (%p143_p2), %v1591_v3 }
 0x5c9   :  { %1465 = vmatpush3.msra.mxu0 (%p143_p2), %v1651_v6 }
 0x5ca   :  { %1466 = vmatprep.subr.mxu0 (%p143_p2), %v1591_v3 }
 0x5cb   :  { %1467 = vmatpush3.msra.mxu0 (%p143_p2), %v1646_v5 }
 0x5cc   :  { %1468 = vmatprep.subr.mxu0 (%p143_p2), %v1591_v3 }
 0x5cd   :  { %1469 = vmatpush3.msra.mxu0 (%p143_p2), %v1641_v4 }
 0x5ce   :  { %1470 = vmatprep.subr.mxu0 (%p143_p2), %v1591_v3 }
 0x5cf   :  { %1471 = vmatpush3.msra.mxu0 (%p143_p2), %v1633_v2 }
 0x5d0   :  { %1472 = vmatprep.subr.mxu0 (%p143_p2), %v1591_v3 }
 0x5d1   :  { %1473 = vmatpush3.msra.mxu0 (%p143_p2), %v1628_v1 }
 0x5d2   :  { %1474 = vmatprep.subr.mxu0 (%p143_p2), %v1591_v3 }
 0x5d3   :  { %1475 = vmatpush3.msra.mxu0 (%p143_p2), %v1623_v0 }
 0x5d4   :  { %1514 = vmatprep.subr.mxu0 (%p143_p2), %v1591_v3 }
 0x674   : > { %v646_v25 = vpop.f32.mrf.mxu0 }
 0x675   : > { %v647_v26 = vadd.f32 %v646_v25, %v1740_v41 }
 0x676   : > { %v1408_v27 = vpop.f32.mrf.mxu0 }
 0x677   : > { %1442 = vmatmul.mubr.f32.vlgmr.msra.gmra.mxu1 %v647_v26 }
 0x678   :  { %1480 = vmatpush3.msra.mxu1 (%p143_p2), %v1701_v16  ;;  %1511 = vmatprep.mubr.msk.f32.mxu1 (%p143_p2), %vm1592_vm0, %v1591_v3 }
 0x679   :  { %1481 = vmatprep.subr.mxu1 (%p143_p2), %v1591_v3 }
 0x67a   :  { %1482 = vmatpush3.msra.mxu1 (%p143_p2), %v1696_v15 }
 0x67b   :  { %1483 = vmatprep.subr.mxu1 (%p143_p2), %v1591_v3 }
 0x67c   :  { %1484 = vmatpush3.msra.mxu1 (%p143_p2), %v1691_v14 }
 0x67d   :  { %1485 = vmatprep.subr.mxu1 (%p143_p2), %v1591_v3 }
 0x67e   :  { %1486 = vmatpush3.msra.mxu1 (%p143_p2), %v1686_v13 }
 0x67f   :  { %1487 = vmatprep.subr.mxu1 (%p143_p2), %v1591_v3 }
 0x680   :  { %1488 = vmatpush3.msra.mxu1 (%p143_p2), %v1681_v12 }
 0x681   :  { %1489 = vmatprep.subr.mxu1 (%p143_p2), %v1591_v3 }
 0x682   :  { %1490 = vmatpush3.msra.mxu1 (%p143_p2), %v1676_v11 }
 0x683   :  { %1491 = vmatprep.subr.mxu1 (%p143_p2), %v1591_v3 }
 0x684   :  { %1492 = vmatpush3.msra.mxu1 (%p143_p2), %v1671_v10 }
 0x685   :  { %1493 = vmatprep.subr.mxu1 (%p143_p2), %v1591_v3 }
 0x686   :  { %1494 = vmatpush3.msra.mxu1 (%p143_p2), %v1666_v9 }
 0x687   :  { %1495 = vmatprep.subr.mxu1 (%p143_p2), %v1591_v3 }
 0x688   :  { %1496 = vmatpush3.msra.mxu1 (%p143_p2), %v1661_v8 }
 0x689   :  { %1497 = vmatprep.subr.mxu1 (%p143_p2), %v1591_v3 }
 0x68a   :  { %1498 = vmatpush3.msra.mxu1 (%p143_p2), %v1656_v7 }
 0x68b   :  { %1499 = vmatprep.subr.mxu1 (%p143_p2), %v1591_v3 }
 0x68c   :  { %1500 = vmatpush3.msra.mxu1 (%p143_p2), %v1651_v6 }
 0x68d   :  { %1501 = vmatprep.subr.mxu1 (%p143_p2), %v1591_v3 }
 0x68e   :  { %1502 = vmatpush3.msra.mxu1 (%p143_p2), %v1646_v5 }
 0x68f   :  { %1503 = vmatprep.subr.mxu1 (%p143_p2), %v1591_v3 }
 0x690   :  { %1504 = vmatpush3.msra.mxu1 (%p143_p2), %v1641_v4 }
 0x691   :  { %1505 = vmatprep.subr.mxu1 (%p143_p2), %v1591_v3 }
 0x692   :  { %1506 = vmatpush3.msra.mxu1 (%p143_p2), %v1633_v2 }
 0x693   :  { %1507 = vmatprep.subr.mxu1 (%p143_p2), %v1591_v3 }
 0x694   :  { %1508 = vmatpush3.msra.mxu1 (%p143_p2), %v1628_v1 }
 0x695   :  { %1509 = vmatprep.subr.mxu1 (%p143_p2), %v1591_v3 }
 0x696   :  { %1510 = vmatpush3.msra.mxu1 (%p143_p2), %v1623_v0 }
 0x737   : > { %v716_v28 = vpop.f32.mrf.mxu1  ;;  %146 = sbr.rel (!%p143_p2) target bundleno = 257 (0x101), region = 43 }
 0x738   : > { %v2038_v42 = vadd.f32 %v716_v28, %v1740_v41  }
 0x739   : > { %v1443_v30 = vpop.f32.mrf.mxu1 }
 0x73a   : > { %v2161_v29 = vmov %v2038_v42 }
 0x73b   : > { %v2162_v42 = vmov %v2161_v29  ;;  %1477 = vmatmul.mubr.f32.vlgmr.msra.gmra.mxu0 (%p143_p2), %v2161_v29 }
 0x73c   :  { %1515 = vmatpush3.msra.mxu0 %v1701_v16  ;;  %1546 = vmatprep.mubr.msk.f32.mxu0 %vm1592_vm0, %v1591_v3 }
 0x73d   :  { %1516 = vmatprep.subr.mxu0 %v1591_v3 }
 0x73e   :  { %1517 = vmatpush3.msra.mxu0 %v1696_v15 }
 0x73f   :  { %1518 = vmatprep.subr.mxu0 %v1591_v3 }
 0x740   :  { %1519 = vmatpush3.msra.mxu0 %v1691_v14 }
 0x741   :  { %1520 = vmatprep.subr.mxu0 %v1591_v3 }
 0x742   :  { %1521 = vmatpush3.msra.mxu0 %v1686_v13 }
 0x743   :  { %1522 = vmatprep.subr.mxu0 %v1591_v3 }
 0x744   :  { %1523 = vmatpush3.msra.mxu0 %v1681_v12 }
 0x745   :  { %1524 = vmatprep.subr.mxu0 %v1591_v3 }
 0x746   :  { %1525 = vmatpush3.msra.mxu0 %v1676_v11 }
 0x747   :  { %1526 = vmatprep.subr.mxu0 %v1591_v3 }
 0x748   :  { %1527 = vmatpush3.msra.mxu0 %v1671_v10 }
 0x749   :  { %1528 = vmatprep.subr.mxu0 %v1591_v3 }
 0x74a   :  { %1529 = vmatpush3.msra.mxu0 %v1666_v9 }
 0x74b   :  { %1530 = vmatprep.subr.mxu0 %v1591_v3 }
 0x74c   :  { %1531 = vmatpush3.msra.mxu0 %v1661_v8 }
 0x74d   :  { %1532 = vmatprep.subr.mxu0 %v1591_v3 }
 0x74e   :  { %1533 = vmatpush3.msra.mxu0 %v1656_v7 }
 0x74f   :  { %1534 = vmatprep.subr.mxu0 %v1591_v3 }
 0x750   :  { %1535 = vmatpush3.msra.mxu0 %v1651_v6 }
 0x751   :  { %1536 = vmatprep.subr.mxu0 %v1591_v3 }
 0x752   :  { %1537 = vmatpush3.msra.mxu0 %v1646_v5 }
 0x753   :  { %1538 = vmatprep.subr.mxu0 %v1591_v3 }
 0x754   :  { %1539 = vmatpush3.msra.mxu0 %v1641_v4 }
 0x755   :  { %1540 = vmatprep.subr.mxu0 %v1591_v3 }
 0x756   :  { %1541 = vmatpush3.msra.mxu0 %v1633_v2 }
 0x757   :  { %1542 = vmatprep.subr.mxu0 %v1591_v3 }
 0x758   :  { %1543 = vmatpush3.msra.mxu0 %v1628_v1 }
 0x759   :  { %1544 = vmatprep.subr.mxu0 %v1591_v3 }
 0x75a   :  { %1545 = vmatpush3.msra.mxu0 %v1623_v0 }
 0x7fb   :  { %v787_v6 = vpop.f32.mrf.mxu0 }
 0x7fc   :  { %v788_v7 = vadd.f32 %v787_v6, %v1740_v41 }
 0x7fd   :  { %v1478_v5 = vpop.f32.mrf.mxu0 }
 0x7fe   :  { %1512 = vmatmul.mubr.f32.vlgmr.msra.gmra.mxu1 %v788_v7 }
 0x8be   :  { %v857_v8 = vpop.f32.mrf.mxu1 }
 0x8bf   :  { %v858_v4 = vadd.f32 %v857_v8, %v1740_v41 }
 0x8c0   :  { %v1513_v9 = vpop.f32.mrf.mxu1 }
 0x8c1   :  { %1547 = vmatmul.mubr.f32.vlgmr.msra.gmra.mxu0 %v858_v4 }
 0x981   :  { %v927_v10 = vpop.f32.mrf.mxu0 }
 0x982   :  { %v928_v2 = vadd.f32 %v927_v10, %v1740_v41 }
 0x983   :  { %v1548_v11 = vpop.f32.mrf.mxu0 }
 0x984   :  { %931 = vst [vmem:[%s2156_s4] sm:$0x3] %v928_v2 }

</bundles_post_ra>
